<compile_context>
chip_gen: v7x
topology: tpu7x:2x2x1
jax: 0.10.0
libtpu: 0.0.40
codegen_flags: <defaults>
</compile_context>

<pallas_src>
import functools

import jax
import jax.numpy as jnp
from jax.experimental import pallas as pl
from jax.experimental.pallas import tpu as pltpu


def _multitask_loss_kernel(x_ref, y_ref, pw_ref, w_ref, out_ref, *,
                           n_valid, tile_rows, lane_w):
    x = x_ref[...].astype(jnp.float32)        # (TR, LW) raw logits (lane-dense)
    y = y_ref[...].astype(jnp.float32)        # (TR, LW) binary labels
    pw = pw_ref[...].astype(jnp.float32)      # (1, LW) pos_weight per label, tiled across lanes
    w = w_ref[...].astype(jnp.float32)        # (1, LW) alpha/beta + per-head mean weights

    # Numerically-stable BCEWithLogits with pos_weight p:
    #   l = (1 - y) * x + (1 + (p - 1) * y) * softplus(-x)
    #   softplus(-x) = max(-x, 0) + log1p(exp(-|x|))
    sp_negx = jnp.maximum(-x, 0.0) + jnp.log1p(jnp.exp(-jnp.abs(x)))
    loss = (1.0 - y) * x + (1.0 + (pw - 1.0) * y) * sp_negx        # (TR, LW)

    # Mask the padded tail using the global flat element index.
    i = pl.program_id(0)
    row = jax.lax.broadcasted_iota(jnp.int32, loss.shape, 0)
    lane = jax.lax.broadcasted_iota(jnp.int32, loss.shape, 1)
    gidx = (i * tile_rows + row) * lane_w + lane
    weighted = jnp.where(gidx < n_valid, w * loss, 0.0)

    # Single weighted reduction -> per-tile partial sum (alpha/beta/mean already folded into w).
    partial = jnp.sum(weighted)
    out_ref[...] = jnp.full(out_ref.shape, partial, jnp.float32)   # lane-dense (1,8,128) store


def multitask_loss(predictions, targets, class_weights, alpha=1.0, beta=1.0,
                   *, lane_width=1024, tile_rows=256):
    """Pallas TPU implementation of MultiTaskLoss.forward.

    predictions: (B, 4) logits (f32 or bf16)
    targets:     (B, 4) {0,1} labels
    class_weights: (4,) -> [0] pos_weight of binary head, [1:] of multilabel head
    Returns scalar float32: alpha * BCE_mean(col0) + beta * BCE_mean(cols1..3)
    """
    B, C = predictions.shape
    assert targets.shape == (B, C)
    assert class_weights.shape == (C,)
    assert lane_width % 128 == 0 and lane_width % C == 0

    n = B * C
    rows = pl.cdiv(n, lane_width)
    if rows <= tile_rows:
        tr = rows                              # single tile; block == full array dims
        rows_pad = rows
    else:
        tr = max(8, (tile_rows // 8) * 8)      # sublane-aligned tiles when tiling
        rows_pad = pl.cdiv(rows, tr) * tr
    num_tiles = rows_pad // tr
    n_pad = rows_pad * lane_width

    # Lane-dense, pure-reshape (row-major contiguous => no transpose traffic): (B,C) -> (rows, LW).
    x2d = jnp.pad(predictions.reshape(-1), (0, n_pad - n)).reshape(rows_pad, lane_width)
    y2d = jnp.pad(targets.reshape(-1), (0, n_pad - n)).reshape(rows_pad, lane_width)

    # Fold alpha/beta and the per-head mean divisors into per-column weights (passed as data,
    # so changing alpha/beta does not recompile the kernel).
    alpha = jnp.asarray(alpha, jnp.float32)
    beta = jnp.asarray(beta, jnp.float32)
    head_w = jnp.concatenate([
        (alpha / B).reshape(1),                              # binary head: mean over B
        jnp.broadcast_to(beta / (B * (C - 1)), (C - 1,)),    # multilabel head: mean over B*(C-1)
    ])                                                       # (C,)
    reps = lane_width // C
    w_row = jnp.tile(head_w, reps).reshape(1, lane_width)
    pw_row = jnp.tile(class_weights.astype(jnp.float32), reps).reshape(1, lane_width)

    kernel = functools.partial(_multitask_loss_kernel,
                               n_valid=n, tile_rows=tr, lane_w=lane_width)

    partials = pl.pallas_call(
        kernel,
        out_shape=jax.ShapeDtypeStruct((num_tiles, 8, 128), jnp.float32),
        grid=(num_tiles,),
        in_specs=[
            pl.BlockSpec((tr, lane_width), lambda i: (i, 0)),
            pl.BlockSpec((tr, lane_width), lambda i: (i, 0)),
            pl.BlockSpec((1, lane_width), lambda i: (0, 0)),
            pl.BlockSpec((1, lane_width), lambda i: (0, 0)),
        ],
        out_specs=pl.BlockSpec((1, 8, 128), lambda i: (i, 0, 0)),
        compiler_params=pltpu.CompilerParams(
            dimension_semantics=("parallel",)),
    )(x2d, y2d, pw_row, w_row)

    # Tiny final reduce over per-tile partials (kept in XLA so the grid can run parallel on v7x).
    return jnp.sum(partials[:, 0, 0])


def _reference_loss(predictions, targets, class_weights, alpha=1.0, beta=1.0):
    """Pure-JAX reference of the PyTorch module, for sanity checking."""
    x = predictions.astype(jnp.float32)
    y = targets.astype(jnp.float32)
    pw = class_weights.astype(jnp.float32)[None, :]
    sp_negx = jnp.maximum(-x, 0.0) + jnp.log1p(jnp.exp(-jnp.abs(x)))
    loss = (1.0 - y) * x + (1.0 + (pw - 1.0) * y) * sp_negx
    loss_binary = jnp.mean(loss[:, 0])
    loss_multilabel = jnp.mean(loss[:, 1:])
    return alpha * loss_binary + beta * loss_multilabel


if __name__ == "__main__":
    key = jax.random.PRNGKey(0)
    k_pred, k_targ, k_cw = jax.random.split(key, 3)

    # Small shape matching the module's (batch_size, 4) convention.
    B = 8
    predictions = jax.random.normal(k_pred, (B, 4), dtype=jnp.float32)
    targets = jax.random.bernoulli(k_targ, 0.5, (B, 4)).astype(jnp.float32)
    class_weights = 0.5 + 2.0 * jax.random.uniform(k_cw, (4,), dtype=jnp.float32)

    total = jax.block_until_ready(
        multitask_loss(predictions, targets, class_weights, 1.0, 1.0))
    ref = _reference_loss(predictions, targets, class_weights, 1.0, 1.0)
    assert jnp.allclose(total, ref, rtol=1e-4, atol=1e-5), (total, ref)

    # Second check: exercises the multi-tile grid + masked padded tail (still tiny: 8000x4 f32).
    k2p, k2t = jax.random.split(jax.random.PRNGKey(1))
    B2 = 8000
    p2 = jax.random.normal(k2p, (B2, 4), dtype=jnp.float32)
    t2 = jax.random.bernoulli(k2t, 0.3, (B2, 4)).astype(jnp.float32)
    total2 = jax.block_until_ready(
        multitask_loss(p2, t2, class_weights, 0.7, 1.3, tile_rows=8))
    ref2 = _reference_loss(p2, t2, class_weights, 0.7, 1.3)
    assert jnp.allclose(total2, ref2, rtol=2e-4, atol=1e-5), (total2, ref2)

    # TODO(synk): the PyTorch module also stashes self.loss_binary / self.loss_multilabel as side
    # attributes; only the returned total_loss is reproduced here.
    print("KERNEL_OK")
</pallas_src>

<mosaic_0001>
module attributes {stable_mosaic.version = 11 : i64} {
  func.func @_multitask_loss_kernel(%arg0: i32, %arg1: memref<1x1024xf32, #tpu.memory_space<vmem>>, %arg2: memref<1x1024xf32, #tpu.memory_space<vmem>>, %arg3: memref<1x1024xf32, #tpu.memory_space<vmem>>, %arg4: memref<1x1024xf32, #tpu.memory_space<vmem>>, %arg5: memref<1x8x128xf32, #tpu.memory_space<vmem>>) attributes {dimension_semantics = [#tpu.dimension_semantics<parallel>], iteration_bounds = array<i64: 1>, scalar_prefetch = 0 : i64, scratch_operands = 0 : i64, tpu.core_type = #tpu.core_type<tc>, window_params = [{transform_indices = @transform_0, window_bounds = array<i64: 1, 1024>}, {transform_indices = @transform_1, window_bounds = array<i64: 1, 1024>}, {pipeline_mode = #tpu.pipeline_mode<synchronous>, transform_indices = @transform_2, window_bounds = array<i64: 1, 1024>}, {pipeline_mode = #tpu.pipeline_mode<synchronous>, transform_indices = @transform_3, window_bounds = array<i64: 1, 1024>}, {transform_indices = @transform_4, window_bounds = array<i64: 1, 8, 128>}]} {
    %c0 = arith.constant 0 : index
    %c0_0 = arith.constant 0 : index
    %0 = vector.load %arg1[%c0, %c0_0] : memref<1x1024xf32, #tpu.memory_space<vmem>>, vector<1x1024xf32>
    %c0_1 = arith.constant 0 : index
    %c0_2 = arith.constant 0 : index
    %1 = vector.load %arg2[%c0_1, %c0_2] : memref<1x1024xf32, #tpu.memory_space<vmem>>, vector<1x1024xf32>
    %c0_3 = arith.constant 0 : index
    %c0_4 = arith.constant 0 : index
    %2 = vector.load %arg3[%c0_3, %c0_4] : memref<1x1024xf32, #tpu.memory_space<vmem>>, vector<1x1024xf32>
    %c0_5 = arith.constant 0 : index
    %c0_6 = arith.constant 0 : index
    %3 = vector.load %arg4[%c0_5, %c0_6] : memref<1x1024xf32, #tpu.memory_space<vmem>>, vector<1x1024xf32>
    %cst = arith.constant 0.000000e+00 : f32
    %4 = vector.broadcast %cst : f32 to vector<1x1024xf32>
    %5 = arith.subf %4, %0 : vector<1x1024xf32>
    %cst_7 = arith.constant 0.000000e+00 : f32
    %6 = vector.broadcast %cst_7 : f32 to vector<1x1024xf32>
    %7 = arith.maximumf %5, %6 : vector<1x1024xf32>
    %8 = math.absf %0 : vector<1x1024xf32>
    %cst_8 = arith.constant 0.000000e+00 : f32
    %9 = vector.broadcast %cst_8 : f32 to vector<1x1024xf32>
    %10 = arith.subf %9, %8 : vector<1x1024xf32>
    %11 = math.exp %10 : vector<1x1024xf32>
    %12 = math.log1p %11 : vector<1x1024xf32>
    %13 = arith.addf %7, %12 : vector<1x1024xf32>
    %cst_9 = arith.constant 1.000000e+00 : f32
    %14 = vector.broadcast %cst_9 : f32 to vector<1x1024xf32>
    %15 = arith.subf %14, %1 : vector<1x1024xf32>
    %16 = arith.mulf %15, %0 : vector<1x1024xf32>
    %cst_10 = arith.constant 1.000000e+00 : f32
    %17 = vector.broadcast %cst_10 : f32 to vector<1x1024xf32>
    %18 = arith.subf %2, %17 : vector<1x1024xf32>
    %19 = arith.mulf %18, %1 : vector<1x1024xf32>
    %cst_11 = arith.constant 1.000000e+00 : f32
    %20 = vector.broadcast %cst_11 : f32 to vector<1x1024xf32>
    %21 = arith.addf %20, %19 : vector<1x1024xf32>
    %22 = arith.mulf %21, %13 : vector<1x1024xf32>
    %23 = arith.addf %16, %22 : vector<1x1024xf32>
    %24 = tpu.iota {dimensions = array<i32: 0>} : vector<1x1024xi32>
    %25 = tpu.iota {dimensions = array<i32: 1>} : vector<1x1024xi32>
    %c1_i32 = arith.constant 1 : i32
    %26 = arith.muli %arg0, %c1_i32 : i32
    %27 = vector.broadcast %26 : i32 to vector<1x1024xi32>
    %28 = arith.addi %27, %24 : vector<1x1024xi32>
    %c1024_i32 = arith.constant 1024 : i32
    %29 = vector.broadcast %c1024_i32 : i32 to vector<1x1024xi32>
    %30 = arith.muli %28, %29 : vector<1x1024xi32>
    %31 = arith.addi %30, %25 : vector<1x1024xi32>
    %c32_i32 = arith.constant 32 : i32
    %32 = vector.broadcast %c32_i32 : i32 to vector<1x1024xi32>
    %33 = arith.cmpi slt, %31, %32 : vector<1x1024xi32>
    %34 = arith.mulf %3, %23 : vector<1x1024xf32>
    %cst_12 = arith.constant 0.000000e+00 : f32
    %35 = vector.broadcast %cst_12 : f32 to vector<1x1024xf32>
    %36 = arith.select %33, %34, %35 : vector<1x1024xi1>, vector<1x1024xf32>
    %37 = vector.shape_cast %36 : vector<1x1024xf32> to vector<1x1x1024xf32>
    %cst_13 = arith.constant dense<0.000000e+00> : vector<1xf32>
    %38 = vector.multi_reduction <add>, %37, %cst_13 [1, 2] : vector<1x1x1024xf32> to vector<1xf32>
    %39 = vector.shape_cast %38 : vector<1xf32> to vector<1x1x1xf32>
    %40 = vector.extract %39[0, 0, 0] : f32 from vector<1x1x1xf32>
    %41 = vector.broadcast %40 : f32 to vector<1x8x128xf32>
    %c0_14 = arith.constant 0 : index
    %c0_15 = arith.constant 0 : index
    %c0_16 = arith.constant 0 : index
    %42 = vector.load %arg5[%c0_14, %c0_15, %c0_16] : memref<1x8x128xf32, #tpu.memory_space<vmem>>, vector<1x8x128xf32>
    tpu.vector_store %arg5[%c0_14, %c0_15, %c0_16], %41 {strides = array<i32>} : memref<1x8x128xf32, #tpu.memory_space<vmem>>, vector<1x8x128xf32>,
    return
  }
  func.func @transform_0(%arg0: i32) -> (i32, i32) {
    %c0_i32 = arith.constant 0 : i32
    %c0_i32_0 = arith.constant 0 : i32
    return %arg0, %c0_i32 : i32, i32
  }
  func.func @transform_1(%arg0: i32) -> (i32, i32) {
    %c0_i32 = arith.constant 0 : i32
    %c0_i32_0 = arith.constant 0 : i32
    return %arg0, %c0_i32 : i32, i32
  }
  func.func @transform_2(%arg0: i32) -> (i32, i32) {
    %c0_i32 = arith.constant 0 : i32
    %c0_i32_0 = arith.constant 0 : i32
    %c0_i32_1 = arith.constant 0 : i32
    return %c0_i32, %c0_i32_0 : i32, i32
  }
  func.func @transform_3(%arg0: i32) -> (i32, i32) {
    %c0_i32 = arith.constant 0 : i32
    %c0_i32_0 = arith.constant 0 : i32
    %c0_i32_1 = arith.constant 0 : i32
    return %c0_i32, %c0_i32_0 : i32, i32
  }
  func.func @transform_4(%arg0: i32) -> (i32, i32, i32) {
    %c0_i32 = arith.constant 0 : i32
    %c0_i32_0 = arith.constant 0 : i32
    %c0_i32_1 = arith.constant 0 : i32
    return %arg0, %c0_i32, %c0_i32_0 : i32, i32, i32
  }
}

</mosaic_0001>

<bundles_post_ra>
// kernel: tpu_custom_call.1
= control target key start
LH: loop header
LB: loop body
LE: loop exit
PB: predicated region body
PF: predicated region fallthrough
CT: control target
= control target key end

     0   :  { %9 = vsyncpa [#allocation3], 0  ;;  %s408_s0 = inlined_call_operand.hbm [shape: f32[1,1024], index: 0, kind: input, shape index: {}]   ;;  %s409_s1 = inlined_call_operand.hbm [shape: f32[1,1024], index: 1, kind: input, shape index: {}]   ;;  %s410_s2 = inlined_call_operand.hbm [shape: f32[1,1024], index: 2, kind: input, shape index: {}]   ;;  %s411_s3 = inlined_call_operand.vmem [shape: f32[1,1024], index: 3, kind: input, shape index: {}]   ;;  %s412_s4 = inlined_call_operand.hbm [shape: f32[1,8,128], index: 4, kind: output, shape index: {}]  }
   0x1   :  { %10 = vsyncpa [#allocation6], 0 }
   0x2   :  { %11 = vsyncpa [#allocation4], 0  ;;  %s308_s15 = smov [#allocation5]   ;;  %s309_s17 = smov [#allocation2]  }
   0x3   :  { %s28_s16 = sshll.u32 %s308_s15, 4  ;;  %s18_s18 = sshll.u32 %s309_s17, 4  ;;  %s29_s16 = int_to_ptr.vmem [resolvable:$true] %s28_s16  ;;  %s19_s18 = int_to_ptr.vmem [resolvable:$true] %s18_s18 }
   0x4   :  { %s214_s21 = scalar_lea.hbm %s409_s1, 128 }
   0x5   :  { %p215_p0 = scmp.ne.s32.totalorder %s409_s1, %s214_s21  ;;  %p218_p1 = scmp.lt.u32.totalorder %s214_s21, %s409_s1 }
   0x7   :  { %p220_p2 = pnand %p218_p1, %p215_p0 }
   0x9   :  { %223 = shalt.err (!%p220_p2)
}
   0xa   :  { %s224_s26 = scalar_lea.vmem %s29_s16, 128  ;;  %p229_p4 = scmp.lt.s32.totalorder %s29_s16, %s29_s16 }
   0xb   :  { %p225_p3 = scmp.ne.s32.totalorder %s29_s16, %s224_s26  ;;  %p230_p5 = scmp.lt.s32.totalorder %s224_s26, %s224_s26 }
   0xd   :  { %p231_p6 = por %p230_p5, %p229_p4 }
   0xf   :  { %p232_p7 = pnand %p231_p6, %p225_p3 }
  0x11   :  { %235 = shalt.err (!%p232_p7)
}
  0x12   :  { %31 = dma.hbm_to_vmem [thread:$0]  %s409_s1, 128, %s29_s16, [#allocation6]  }
  0x13   :  { %s236_s5 = scalar_lea.hbm %s408_s0, 128 }
  0x14   :  { %p237_p8 = scmp.ne.s32.totalorder %s408_s0, %s236_s5  ;;  %p240_p9 = scmp.lt.u32.totalorder %s236_s5, %s408_s0 }
  0x16   :  { %p242_p10 = pnand %p240_p9, %p237_p8 }
  0x18   :  { %245 = shalt.err (!%p242_p10)
}
  0x19   :  { %s246_s10 = scalar_lea.vmem %s19_s18, 128  ;;  %p251_p12 = scmp.lt.s32.totalorder %s19_s18, %s19_s18 }
  0x1a   :  { %p247_p11 = scmp.ne.s32.totalorder %s19_s18, %s246_s10  ;;  %p252_p13 = scmp.lt.s32.totalorder %s246_s10, %s246_s10 }
  0x1c   :  { %p253_p0 = por %p252_p13, %p251_p12 }
  0x1e   :  { %p254_p1 = pnand %p253_p0, %p247_p11 }
  0x20   :  { %257 = shalt.err (!%p254_p1)
}
  0x21   :  { %21 = dma.hbm_to_vmem [thread:$0]  %s408_s0, 128, %s19_s18, [#allocation3]  }
  0x22   :  { %s310_s12 = smov [#allocation7]   ;;  %s258_s16 = scalar_lea.hbm %s410_s2, 128 }
  0x23   :  { %s38_s13 = sshll.u32 %s310_s12, 4  ;;  %p259_p2 = scmp.ne.s32.totalorder %s410_s2, %s258_s16  ;;  %s39_s13 = int_to_ptr.vmem [resolvable:$true] %s38_s13 }
  0x24   :  { %p262_p3 = scmp.lt.u32.totalorder %s258_s16, %s410_s2 }
  0x26   :  { %p264_p4 = pnand %p262_p3, %p259_p2 }
  0x28   :  { %267 = shalt.err (!%p264_p4)
}
  0x29   :  { %s268_s22 = scalar_lea.vmem %s39_s13, 128  ;;  %p273_p6 = scmp.lt.s32.totalorder %s39_s13, %s39_s13 }
  0x2a   :  { %p269_p5 = scmp.ne.s32.totalorder %s39_s13, %s268_s22  ;;  %p274_p7 = scmp.lt.s32.totalorder %s268_s22, %s268_s22 }
  0x2c   :  { %p275_p8 = por %p274_p7, %p273_p6 }
  0x2e   :  { %p276_p9 = pnand %p275_p8, %p269_p5 }
  0x30   :  { %279 = shalt.err (!%p276_p9)
}
  0x31   :  { %41 = dma.hbm_to_vmem [thread:$0]  %s410_s2, 128, %s39_s13, [#allocation6]  }
  0x32   :  { %302 = dma.done.wait [#allocation3], 128  }
  0x33   :  { %303 = vsyncadd [#allocation3], 4294967168 }
  0x34   :  { %304 = dma.done.wait [#allocation6], 256  }
  0x35   :  { %305 = vsyncadd [#allocation6], 4294967040  ;;  %v53_v0 = vld [vmem:[#allocation2] sm:$0xff]  ;;  %v55_v6 = vld [vmem:[#allocation7] sm:$0xff]  ;;  %v80_v9 = vlaneseq  ;;  %vm160_vm5 = vcmask 1040384  }
  0x36   :  { %v59_v1 = vand.u32 2147483647, %v53_v0  ;;  %v203_v8 = vadd.f32 -1.0, %v55_v6  ;;  %v54_v10 = vld [vmem:[#allocation5] sm:$0xff]  ;;  %v57_v12 = vsub.f32 0.0, %v53_v0  ;;  %v56_v34 = vld [vmem:[%s411_s3] sm:$0xff] }
  0x37   :  { %v373_v15 = vshrl.u32 %v80_v9, 7  ;;  %v83_v17 = vand.u32 127, %v80_v9  ;;  %v73_v20 = vsub.f32 1.0, %v54_v10  ;;  %s311_s3 = smov [#allocation8]  }
  0x38   :  { %v60_v2 = vsub.f32 0.0, %v59_v1  ;;  %v76_v14 = vmul.f32 %v203_v8, %v54_v10  ;;  %v58_v19 = vmax.f32 %v57_v12, 0.0  ;;  %s193_s24 = sshll.u32 %s311_s3, 4  ;;  %s194_s24 = int_to_ptr.vmem [resolvable:$true] %s193_s24 }
  0x39   :  { %v93_v23 = vmul.u32 1024, %v373_v15  ;;  %v84_v25 = vadd.s32 128, %v83_v17  ;;  %v85_v26 = vadd.s32 256, %v83_v17  ;;  %v86_v27 = vadd.s32 384, %v83_v17  ;;  %s280_s26 = scalar_lea.vmem %s194_s24, 128  ;;  %p285_p11 = scmp.lt.s32.totalorder %s194_s24, %s194_s24 }
  0x3a   :  { %v61_v3 = vmul.f32 1.442695, %v60_v2  ;;  %v77_v22 = vadd.f32 1.0, %v76_v14  ;;  %v74_v29 = vmul.f32 %v73_v20, %v53_v0  ;;  %v87_v31 = vadd.s32 512, %v83_v17  ;;  %p281_p10 = scmp.ne.s32.totalorder %s194_s24, %s280_s26  ;;  %p286_p12 = scmp.lt.s32.totalorder %s280_s26, %s280_s26 }
  0x3b   :  { %v88_v32 = vadd.s32 640, %v83_v17  ;;  %v94_v33 = vadd.s32 %v93_v23, %v83_v17  ;;  %v95_v35 = vadd.s32 %v93_v23, %v84_v25  ;;  %v96_v36 = vadd.s32 %v93_v23, %v85_v26 }
  0x3c   :  { %210 = vpow2.f32 %v61_v3  ;;  %v97_v37 = vadd.s32 %v93_v23, %v86_v27  ;;  %v114_v38 = vsub.s32 0, %v373_v15  ;;  %v118_v40 = vsub.s32 1, %v373_v15  ;;  %p287_p13 = por %p286_p12, %p285_p11 }
  0x3d   :  { %v122_v41 = vsub.s32 2, %v373_v15  ;;  %v126_v42 = vsub.s32 3, %v373_v15  ;;  %v89_v43 = vadd.s32 768, %v83_v17  ;;  %v90_v44 = vadd.s32 896, %v83_v17 }
  0x3e   :  { %v130_v45 = vsub.s32 4, %v373_v15  ;;  %v98_v46 = vadd.s32 %v93_v23, %v87_v31  ;;  %v99_v47 = vadd.s32 %v93_v23, %v88_v32  ;;  %vm102_vm1 = vcmp.lt.s32.totalorder %v94_v33, 32  ;;  %p288_p0 = pnand %p287_p13, %p281_p10 }
  0x3f   :  { %vm103_vm2 = vcmp.lt.s32.totalorder %v95_v35, 32  ;;  %vm104_vm3 = vcmp.lt.s32.totalorder %v96_v36, 32  ;;  %vm105_vm4 = vcmp.lt.s32.totalorder %v97_v37, 32  ;;  %v134_v49 = vsub.s32 5, %v373_v15 }
  0x40   :  { %v100_v54 = vadd.s32 %v93_v23, %v89_v43  ;;  %v138_v56 = vsub.s32 6, %v373_v15  ;;  %vm106_vm6 = vcmp.lt.s32.totalorder %v98_v46, 32  ;;  %v101_v60 = vadd.s32 %v93_v23, %v90_v44 }
  0x41   :  { %v142_v62 = vsub.s32 7, %v373_v15  ;;  %vm107_vm7 = vcmp.lt.s32.totalorder %v99_v47, 32 }
  0x42   :  { %vm108_vm8 = vcmp.lt.s32.totalorder %v100_v54, 32  ;;  %vm109_vm9 = vcmp.lt.s32.totalorder %v101_v60, 32 }
  0x46   :  { %v211_v4 = vpop.eup %210 }
  0x47   :  { %v63_v5 = vadd.f32 1.0, %v211_v4  ;;  %v66_v7 = vmul.f32 -0.5, %v211_v4  ;;  %v69_v13 = vand.u32 2147483647, %v211_v4 }
  0x49   :  { %212 = vlog2.f32 %v63_v5  ;;  %v67_v11 = vadd.f32 1.0, %v66_v7  ;;  %vm70_vm0 = vcmp.lt.f32.partialorder %v69_v13, 0.0004427343 }
  0x4b   :  { %v68_v16 = vmul.f32 %v211_v4, %v67_v11 }
  0x53   :  { %v213_v18 = vpop.eup %212 }
  0x54   :  { %v65_v21 = vmul.f32 0.6931472, %v213_v18 }
  0x56   :  { %v71_v24 = vsel %vm70_vm0, %v68_v16, %v65_v21 }
  0x57   :  { %v72_v28 = vadd.f32 %v71_v24, %v58_v19 }
  0x59   :  { %v78_v30 = vmul.f32 %v77_v22, %v72_v28 }
  0x5b   :  { %v79_v39 = vadd.f32 %v78_v30, %v74_v29 }
  0x5d   :  { %v110_v48 = vmul.f32 %v79_v39, %v56_v34 }
  0x5f   :  { %v115_v50 = vrot.slane %v110_v48, %v114_v38  ;;  %v119_v51 = vrot.slane %v110_v48, %v118_v40  ;;  %v123_v52 = vrot.slane %v110_v48, %v122_v41  ;;  %v127_v53 = vrot.slane %v110_v48, %v126_v42 }
  0x60   :  { %v131_v55 = vrot.slane %v110_v48, %v130_v45  ;;  %v135_v61 = vrot.slane %v110_v48, %v134_v49  ;;  %v139_v3 = vrot.slane %v110_v48, %v138_v56  ;;  %v143_v7 = vrot.slane %v110_v48, %v142_v62 }
  0x61   :  { %v152_v57 = vsel %vm102_vm1, %v115_v50, 0.0  ;;  %v153_v58 = vsel %vm103_vm2, %v119_v51, 0.0  ;;  %v154_v59 = vsel %vm104_vm3, %v123_v52, 0.0  ;;  %v155_v63 = vsel %vm105_vm4, %v127_v53, 0.0 }
  0x62   :  { %v161_v0 = vsel %vm160_vm5, %v152_v57, 0.0  ;;  %v162_v1 = vsel %vm160_vm5, %v153_v58, 0.0  ;;  %v164_v2 = vsel %vm160_vm5, %v154_v59, 0.0  ;;  %v156_v4 = vsel %vm106_vm6, %v131_v55, 0.0 }
  0x63   :  { %v163_v5 = vadd.f32 %v162_v1, %v161_v0  ;;  %v166_v6 = vsel %vm160_vm5, %v155_v63, 0.0  ;;  %v157_v8 = vsel %vm107_vm7, %v135_v61, 0.0  ;;  %v168_v10 = vsel %vm160_vm5, %v156_v4, 0.0 }
  0x64   :  { %v158_v11 = vsel %vm108_vm8, %v139_v3, 0.0  ;;  %v170_v13 = vsel %vm160_vm5, %v157_v8, 0.0  ;;  %v159_v14 = vsel %vm109_vm9, %v143_v7, 0.0 }
  0x65   :  { %v165_v9 = vadd.f32 %v164_v2, %v163_v5  ;;  %v172_v16 = vsel %vm160_vm5, %v158_v11, 0.0  ;;  %v174_v18 = vsel %vm160_vm5, %v159_v14, 0.0 }
  0x67   :  { %v167_v12 = vadd.f32 %v166_v6, %v165_v9 }
  0x69   :  { %v169_v15 = vadd.f32 %v168_v10, %v167_v12 }
  0x6b   :  { %v171_v17 = vadd.f32 %v170_v13, %v169_v15 }
  0x6d   :  { %v173_v19 = vadd.f32 %v172_v16, %v171_v17 }
  0x6f   :  { %v175_v20 = vadd.f32 %v174_v18, %v173_v19 }
  0x71   :  { %176 = vadd.xlane.f32.xlu0 %v175_v20 }
  0xfe   :  { %v177_v21 = vpop.xlane.xlu0 %176 }
  0xff   :  { %v178_v22 = vrot.slane %v177_v21, 4 }
 0x101   :  { %v179_v23 = vadd.f32 %v178_v22, %v177_v21 }
 0x103   :  { %v180_v24 = vrot.slane %v179_v23, 2 }
 0x105   :  { %v181_v25 = vadd.f32 %v180_v24, %v179_v23 }
 0x107   :  { %v182_v26 = vrot.slane %v181_v25, 1 }
 0x109   :  { %v183_v27 = vadd.f32 %v182_v26, %v181_v25 }
 0x10b   :  { %204 = vpush %v183_v27 }
 0x13c   :  { %s205_s25 = spop %204 }
 0x13d   :  { %v185_v28 = vstv %s205_s25 }
 0x13e   :  { %186 = vst [vmem:[#allocation8] sm:$0xff] %v185_v28 }
 0x13f   :  { %291 = shalt.err (!%p288_p0)
}
 0x140   :  { %s292_s29 = scalar_lea.hbm %s412_s4, 128 }
 0x141   :  { %p293_p1 = scmp.ne.s32.totalorder %s412_s4, %s292_s29  ;;  %p296_p2 = scmp.lt.u32.totalorder %s292_s29, %s412_s4 }
 0x143   :  { %p298_p3 = pnand %p296_p2, %p293_p1 }
 0x145   :  { %301 = shalt.err (!%p298_p3)
}
 0x146   :  { %196 = dma.vmem_to_hbm [thread:$0]  %s194_s24, 128, %s412_s4, [#allocation4]  }
 0x147   :  { %306 = dma.done.wait [#allocation4], 128  }
 0x148   :  { %307 = vsyncadd [#allocation4], 4294967168 }
 0x149   :  { %200 = vsyncpa [#allocation3], 1 }
 0x14a   :  { %201 = vsyncpa [#allocation6], 1 }
 0x14b   :  { %202 = vsyncpa [#allocation4], 1 }

</bundles_post_ra>
